<compile_context>
chip_gen: v7x
topology: tpu7x:2x2x1
jax: 0.10.0
libtpu: 0.0.40
codegen_flags: <defaults>
</compile_context>

<pallas_src>
from functools import partial

import jax
import jax.numpy as jnp
from jax.experimental import pallas as pl
from jax.experimental.pallas import tpu as pltpu


# ----------------------------------------------------------------------------
# Kernel A: fc1 + fused QKV projection for one (batch, N-tile) block.
#   x1  = features @ W1 + b1
#   qkv = x1 @ [Wq | Wk | Wv]     (single 3*d_model wide matmul)
# ----------------------------------------------------------------------------
def _qkv_proj_kernel(feat_ref, w1_ref, b1_ref, wqkv_ref, qkv_ref):
    f32 = jnp.float32
    x = feat_ref[0]                                               # (TN, d_points)
    x1 = jnp.dot(x.astype(jnp.bfloat16), w1_ref[...],
                 preferred_element_type=f32) + b1_ref[...]        # (TN, dm)
    qkv_ref[0] = jnp.dot(x1.astype(jnp.bfloat16), wqkv_ref[...],
                         preferred_element_type=f32)              # (TN, 3*dm)


# ----------------------------------------------------------------------------
# Kernel B: positional MLP + vector attention + fc2 + residual for one
# (batch, N-tile) block.  Gathered neighbour data arrives pre-packed as
#   g = [k_gathered | v_gathered | rel_xyz]   with shape (TN*k, 2*dm + 3).
# ----------------------------------------------------------------------------
def _point_attn_kernel(g_ref, q_ref, feat_ref,
                       wd1_ref, bd1_ref, wd2_ref, bd2_ref,
                       wg1_ref, bg1_ref, wg2_ref, bg2_ref,
                       w2_ref, b2_ref,
                       res_ref, attn_ref, *, tn, kk, dm):
    f32, bf16 = jnp.float32, jnp.bfloat16

    g = g_ref[0]                               # (tn*kk, 2*dm + 3) f32
    k_g = g[:, :dm]                            # gathered keys
    v_g = g[:, dm:2 * dm]                      # gathered values
    rel = g[:, 2 * dm:]                        # xyz[i] - xyz[knn(i, j)]
    q = q_ref[0]                               # (tn, dm)

    # fc_delta layer 1: contraction dim is 3 -> three VPU broadcast FMAs
    # instead of a near-empty MXU pass.
    wd1 = wd1_ref[...]                         # (3, dm) f32
    h = (rel[:, 0:1] * wd1[0:1, :]
         + rel[:, 1:2] * wd1[1:2, :]
         + rel[:, 2:3] * wd1[2:3, :]
         + bd1_ref[...])
    h = jnp.maximum(h, 0.0)
    pos = jnp.dot(h.astype(bf16), wd2_ref[...],
                  preferred_element_type=f32) + bd2_ref[...]      # (tn*kk, dm)

    # k is a multiple of 8 so these sublane-split reshapes are layout-free.
    pos3 = pos.reshape(tn, kk, dm)
    k3 = k_g.reshape(tn, kk, dm)
    v3 = v_g.reshape(tn, kk, dm)

    # fc_gamma on (q - k + pos_enc); q broadcast over the neighbour axis.
    gin = (q[:, None, :] - k3 + pos3).reshape(tn * kk, dm)
    h2 = jnp.maximum(
        jnp.dot(gin.astype(bf16), wg1_ref[...],
                preferred_element_type=f32) + bg1_ref[...], 0.0)
    logits = jnp.dot(h2.astype(bf16), wg2_ref[...],
                     preferred_element_type=f32) + bg2_ref[...]   # (tn*kk, dm)

    # softmax over the neighbour axis (torch dim=-2), per point / per channel.
    scale = 1.0 / (float(dm) ** 0.5)
    logits3 = (logits * scale).reshape(tn, kk, dm)
    m = jnp.max(logits3, axis=1, keepdims=True)
    e = jnp.exp(logits3 - m)
    denom = jnp.sum(e, axis=1, keepdims=True)
    attn3 = e * pl.reciprocal(denom, approx=True)                 # (tn, kk, dm)

    # einsum('bmnf,bmnf->bmf', attn, v + pos_enc)
    agg = jnp.sum(attn3 * (v3 + pos3), axis=1)                    # (tn, dm)

    # fc2 + residual
    res_ref[0] = (jnp.dot(agg.astype(bf16), w2_ref[...],
                          preferred_element_type=f32)
                  + b2_ref[...] + feat_ref[0])

    # TODO(synk): flattening attn to a lane-dense (tn, kk*dm) slab would avoid
    # masked 32-lane stores, but the required (tn,kk,dm)->(tn,kk*dm) lane-merge
    # relayout is not reliably lowered by Mosaic; keep the natural block layout.
    attn_ref[0] = attn3


# ----------------------------------------------------------------------------
# Wrapper
# ----------------------------------------------------------------------------
def transformer_block(xyz, features, params, k, tile_n=None):
    B, N, _ = xyz.shape
    d_points = features.shape[-1]
    dm = params["Wq"].shape[0]
    if tile_n is None:
        tile_n = min(N, 128)
    assert N % tile_n == 0 and tile_n % 8 == 0, "tile_n must divide N, mult of 8"
    nt = N // tile_n
    f32, bf16 = jnp.float32, jnp.bfloat16

    # ---- kNN (plain-JAX glue): top_k instead of full argsort ---------------
    # TODO(synk): data-dependent sort / top-k has no clean Pallas TPU lowering.
    d2 = jnp.sum((xyz[:, :, None, :] - xyz[:, None, :, :]) ** 2, axis=-1)
    _, knn_idx = jax.lax.top_k(-d2, k)                  # (B, N, k) int32

    # ---- weights: fused QKV, bf16 matmul operands ---------------------------
    w1 = params["W1"].astype(bf16)
    wqkv = jnp.concatenate([params["Wq"], params["Wk"], params["Wv"]],
                           axis=1).astype(bf16)         # (dm, 3*dm)
    wd2 = params["Wd2"].astype(bf16)
    wg1 = params["Wg1"].astype(bf16)
    wg2 = params["Wg2"].astype(bf16)
    w2 = params["W2"].astype(bf16)

    tiled = lambda c: pl.BlockSpec((1, tile_n, c), lambda b, t: (b, t, 0))
    shared = lambda s: pl.BlockSpec(s, lambda b, t: (0,) * len(s))
    parallel2 = pltpu.CompilerParams(
        dimension_semantics=("parallel", "parallel"))

    # ---- Kernel A: fc1 + fused QKV projection -------------------------------
    qkv = pl.pallas_call(
        _qkv_proj_kernel,
        out_shape=jax.ShapeDtypeStruct((B, N, 3 * dm), f32),
        grid_spec=pltpu.PrefetchScalarGridSpec(
            num_scalar_prefetch=0,
            grid=(B, nt),
            in_specs=[tiled(d_points), shared(w1.shape),
                      shared(params["b1"].shape), shared(wqkv.shape)],
            out_specs=tiled(3 * dm)),
        compiler_params=parallel2,
    )(features, w1, params["b1"], wqkv)

    q = qkv[..., :dm]                                   # (B, N, dm)
    kv = qkv[..., dm:]                                  # (B, N, 2*dm)

    # ---- neighbour gather (plain-JAX glue; no one-hot matrices) -------------
    # TODO(synk): an in-kernel gather (scalar-prefetch knn_idx + dynamic gather
    # / per-row DMA) would avoid materializing the gathered tensor in HBM;
    # kept as an XLA gather for portability.
    take = jax.vmap(lambda p, i: p[i])                  # (N,C),(N,k) -> (N,k,C)
    kv_g = take(kv, knn_idx)                            # (B, N, k, 2*dm)
    rel = xyz[:, :, None, :] - take(xyz, knn_idx)       # (B, N, k, 3)
    g = jnp.concatenate([kv_g, rel], axis=-1).reshape(B, N * k, 2 * dm + 3)

    # ---- Kernel B: pos-enc MLP + vector attention + fc2 + residual ----------
    kern = partial(_point_attn_kernel, tn=tile_n, kk=k, dm=dm)
    res, attn = pl.pallas_call(
        kern,
        out_shape=(jax.ShapeDtypeStruct((B, N, d_points), f32),
                   jax.ShapeDtypeStruct((B, N, k, dm), f32)),
        grid_spec=pltpu.PrefetchScalarGridSpec(
            num_scalar_prefetch=0,
            grid=(B, nt),
            in_specs=[
                pl.BlockSpec((1, tile_n * k, 2 * dm + 3),
                             lambda b, t: (b, t, 0)),         # gathered k|v|rel
                tiled(dm),                                    # q
                tiled(d_points),                              # features (resid)
                shared(params["Wd1"].shape), shared(params["bd1"].shape),
                shared(wd2.shape), shared(params["bd2"].shape),
                shared(wg1.shape), shared(params["bg1"].shape),
                shared(wg2.shape), shared(params["bg2"].shape),
                shared(w2.shape), shared(params["b2"].shape),
            ],
            out_specs=(tiled(d_points),
                       pl.BlockSpec((1, tile_n, k, dm),
                                    lambda b, t: (b, t, 0, 0)))),
        compiler_params=parallel2,
    )(g, q, features,
      params["Wd1"], params["bd1"], wd2, params["bd2"],
      wg1, params["bg1"], wg2, params["bg2"], w2, params["b2"])

    return res, attn


def reference(xyz, features, params, k):
    """Pure-JAX (f32) reference mirroring the PyTorch forward."""
    d2 = jnp.sum((xyz[:, :, None, :] - xyz[:, None, :, :]) ** 2, axis=-1)
    _, knn_idx = jax.lax.top_k(-d2, k)                  # same kNN as the kernel
    take = jax.vmap(lambda p, i: p[i])
    knn_xyz = take(xyz, knn_idx)
    pre = features
    x = features @ params["W1"] + params["b1"]
    q = x @ params["Wq"]
    kt = take(x @ params["Wk"], knn_idx)
    v = take(x @ params["Wv"], knn_idx)
    relp = xyz[:, :, None, :] - knn_xyz
    pos = (jnp.maximum(relp @ params["Wd1"] + params["bd1"], 0.0)
           @ params["Wd2"] + params["bd2"])
    attn = (jnp.maximum((q[:, :, None, :] - kt + pos) @ params["Wg1"]
                        + params["bg1"], 0.0) @ params["Wg2"] + params["bg2"])
    attn = jax.nn.softmax(attn / jnp.sqrt(jnp.float32(kt.shape[-1])), axis=-2)
    res = jnp.einsum("bmnf,bmnf->bmf", attn, v + pos)
    res = res @ params["W2"] + params["b2"] + pre
    return res, attn


if __name__ == "__main__":
    B, N, d_points, d_model, K = 2, 64, 16, 32, 8
    TILE_N = 32

    key = jax.random.PRNGKey(0)
    keys = jax.random.split(key, 20)
    lin = lambda kw, shape: jax.random.normal(kw, shape, jnp.float32) * 0.1
    params = {
        "W1": lin(keys[0], (d_points, d_model)), "b1": lin(keys[1], (1, d_model)),
        "Wq": lin(keys[2], (d_model, d_model)),
        "Wk": lin(keys[3], (d_model, d_model)),
        "Wv": lin(keys[4], (d_model, d_model)),
        "Wd1": lin(keys[5], (3, d_model)), "bd1": lin(keys[6], (1, d_model)),
        "Wd2": lin(keys[7], (d_model, d_model)), "bd2": lin(keys[8], (1, d_model)),
        "Wg1": lin(keys[9], (d_model, d_model)), "bg1": lin(keys[10], (1, d_model)),
        "Wg2": lin(keys[11], (d_model, d_model)), "bg2": lin(keys[12], (1, d_model)),
        "W2": lin(keys[13], (d_model, d_points)), "b2": lin(keys[14], (1, d_points)),
    }
    xyz = jax.random.normal(keys[15], (B, N, 3), jnp.float32)
    features = jax.random.normal(keys[16], (B, N, d_points), jnp.float32)

    res, attn = transformer_block(xyz, features, params, K, tile_n=TILE_N)
    jax.block_until_ready((res, attn))

    res_ref, attn_ref = reference(xyz, features, params, K)
    assert jnp.allclose(res, res_ref, atol=1e-2, rtol=1e-2), "res mismatch"
    assert jnp.allclose(attn, attn_ref, atol=1e-2, rtol=1e-2), "attn mismatch"
    print("KERNEL_OK")
</pallas_src>

<mosaic_0001>
module attributes {stable_mosaic.version = 11 : i64} {
  func.func @_qkv_proj_kernel(%arg0: i32, %arg1: i32, %arg2: memref<1x32x16xf32, #tpu.memory_space<vmem>>, %arg3: memref<16x32xbf16, #tpu.memory_space<vmem>>, %arg4: memref<1x32xf32, #tpu.memory_space<vmem>>, %arg5: memref<32x96xbf16, #tpu.memory_space<vmem>>, %arg6: memref<1x32x96xf32, #tpu.memory_space<vmem>>) attributes {dimension_semantics = [#tpu.dimension_semantics<parallel>, #tpu.dimension_semantics<parallel>], iteration_bounds = array<i64: 2, 2>, scalar_prefetch = 0 : i64, scratch_operands = 0 : i64, tpu.core_type = #tpu.core_type<tc>, window_params = [{transform_indices = @transform_0, window_bounds = array<i64: 1, 32, 16>}, {pipeline_mode = #tpu.pipeline_mode<synchronous>, transform_indices = @transform_1, window_bounds = array<i64: 16, 32>}, {pipeline_mode = #tpu.pipeline_mode<synchronous>, transform_indices = @transform_2, window_bounds = array<i64: 1, 32>}, {pipeline_mode = #tpu.pipeline_mode<synchronous>, transform_indices = @transform_3, window_bounds = array<i64: 32, 96>}, {transform_indices = @transform_4, window_bounds = array<i64: 1, 32, 96>}]} {
    %c0 = arith.constant 0 : index
    %c0_0 = arith.constant 0 : index
    %c0_1 = arith.constant 0 : index
    %0 = vector.load %arg2[%c0, %c0_0, %c0_1] : memref<1x32x16xf32, #tpu.memory_space<vmem>>, vector<1x32x16xf32>
    %1 = vector.shape_cast %0 : vector<1x32x16xf32> to vector<32x16xf32>
    %2 = arith.truncf %1 : vector<32x16xf32> to vector<32x16xbf16>
    %c0_2 = arith.constant 0 : index
    %c0_3 = arith.constant 0 : index
    %3 = vector.load %arg3[%c0_2, %c0_3] : memref<16x32xbf16, #tpu.memory_space<vmem>>, vector<16x32xbf16>
    %cst = arith.constant dense<0.000000e+00> : vector<32x32xf32>
    %4 = tpu.matmul %2, %3, %cst {dimension_numbers = #tpu.dot_dimension_numbers<[1], [0], [0], [1], [0, 0, 1, 1], [], []>} : vector<32x16xbf16>, vector<16x32xbf16>, vector<32x32xf32> -> vector<32x32xf32>
    %c0_4 = arith.constant 0 : index
    %c0_5 = arith.constant 0 : index
    %5 = vector.load %arg4[%c0_4, %c0_5] : memref<1x32xf32, #tpu.memory_space<vmem>>, vector<1x32xf32>
    %6 = vector.broadcast %5 : vector<1x32xf32> to vector<32x32xf32>
    %7 = arith.addf %4, %6 : vector<32x32xf32>
    %8 = arith.truncf %7 : vector<32x32xf32> to vector<32x32xbf16>
    %c0_6 = arith.constant 0 : index
    %c0_7 = arith.constant 0 : index
    %9 = vector.load %arg5[%c0_6, %c0_7] : memref<32x96xbf16, #tpu.memory_space<vmem>>, vector<32x96xbf16>
    %cst_8 = arith.constant dense<0.000000e+00> : vector<32x96xf32>
    %10 = tpu.matmul %8, %9, %cst_8 {dimension_numbers = #tpu.dot_dimension_numbers<[1], [0], [0], [1], [0, 0, 1, 1], [], []>} : vector<32x32xbf16>, vector<32x96xbf16>, vector<32x96xf32> -> vector<32x96xf32>
    %c0_9 = arith.constant 0 : index
    %c0_10 = arith.constant 0 : index
    %c0_11 = arith.constant 0 : index
    %11 = vector.load %arg6[%c0_9, %c0_10, %c0_11] : memref<1x32x96xf32, #tpu.memory_space<vmem>>, vector<1x32x96xf32>
    %12 = vector.shape_cast %11 : vector<1x32x96xf32> to vector<32x96xf32>
    %13 = vector.shape_cast %10 : vector<32x96xf32> to vector<1x32x96xf32>
    tpu.vector_store %arg6[%c0_9, %c0_10, %c0_11], %13 {strides = array<i32>} : memref<1x32x96xf32, #tpu.memory_space<vmem>>, vector<1x32x96xf32>,
    return
  }
  func.func @transform_0(%arg0: i32, %arg1: i32) -> (i32, i32, i32) {
    %c0_i32 = arith.constant 0 : i32
    %c0_i32_0 = arith.constant 0 : i32
    return %arg0, %arg1, %c0_i32 : i32, i32, i32
  }
  func.func @transform_1(%arg0: i32, %arg1: i32) -> (i32, i32) {
    %c0_i32 = arith.constant 0 : i32
    %c0_i32_0 = arith.constant 0 : i32
    %c0_i32_1 = arith.constant 0 : i32
    return %c0_i32, %c0_i32_0 : i32, i32
  }
  func.func @transform_2(%arg0: i32, %arg1: i32) -> (i32, i32) {
    %c0_i32 = arith.constant 0 : i32
    %c0_i32_0 = arith.constant 0 : i32
    %c0_i32_1 = arith.constant 0 : i32
    return %c0_i32, %c0_i32_0 : i32, i32
  }
  func.func @transform_3(%arg0: i32, %arg1: i32) -> (i32, i32) {
    %c0_i32 = arith.constant 0 : i32
    %c0_i32_0 = arith.constant 0 : i32
    %c0_i32_1 = arith.constant 0 : i32
    return %c0_i32, %c0_i32_0 : i32, i32
  }
  func.func @transform_4(%arg0: i32, %arg1: i32) -> (i32, i32, i32) {
    %c0_i32 = arith.constant 0 : i32
    %c0_i32_0 = arith.constant 0 : i32
    return %arg0, %arg1, %c0_i32 : i32, i32, i32
  }
}

</mosaic_0001>

<bundles_post_ra>
// kernel: tpu_custom_call.1
= control target key start
LH: loop header
LB: loop body
LE: loop exit
PB: predicated region body
PF: predicated region fallthrough
CT: control target
= control target key end

     0   :  { %9 = vsyncpa [#allocation3], 0  ;;  %s881_s0 = inlined_call_operand.vmem [shape: f32[2,64,16], index: 0, kind: input, shape index: {}]   ;;  %s882_s1 = inlined_call_operand.vmem [shape: bf16[16,32], index: 1, kind: input, shape index: {}]   ;;  %s883_s2 = inlined_call_operand.vmem [shape: f32[1,32], index: 2, kind: input, shape index: {}]   ;;  %s884_s3 = inlined_call_operand.vmem [shape: bf16[32,96], index: 3, kind: input, shape index: {}]   ;;  %s885_s4 = inlined_call_operand.hbm [shape: f32[2,64,96], index: 4, kind: output, shape index: {}]  }
   0x1   :  { %11 = vsyncpa [#allocation3 + $0x1], 0  ;;  %s726_s15 = smov 0   ;;  %s728_s16 = smov 0  }
   0x2   :  { %s730_s17 = smov 0   ;;  %s732_s18 = smov 0  }
   0x3   :  { %s734_s19 = smov 0   ;;  %s736_s20 = smov 0  }
   0x4   :  { %s738_s21 = smov 0   ;;  %s740_s22 = smov 0  }
   0x5 LB: > { %s482_s23 = sadd.s32 4294967295, %s696_s22   ;;  %s483_s24 = sadd.s32 4294967294, %s696_s22   ;;  %s696_s22 = sphi %s740_s22, %s17_s22   ;;  %s692_s21 = sphi %s738_s21, %s894_s21   ;;  %s688_s20 = sphi %s736_s20, %s893_s20   ;;  %s684_s19 = sphi %s734_s19, %s892_s19   ;;  %s680_s18 = sphi %s732_s18, %s891_s18   ;;  %s676_s17 = sphi %s730_s17, %s890_s17   ;;  %s672_s16 = sphi %s728_s16, %s889_s16   ;;  %s668_s15 = sphi %s726_s15, %s888_s15  }
   0x6   : > { %s26_s25 = sadd.s32 1, %s688_s20  ;;  %s29_s26 = sadd.s32 1, %s692_s21 }
   0x7   : > { %p27_p0 = scmp.ge.s32.totalorder %s26_s25, 2  ;;  %p139_p1 = scmp.ne.s32.totalorder %s676_s17, %s672_s16 }
   0x8   : > { %p140_p2 = scmp.eq.s32.totalorder %s482_s23, 3  ;;  %p145_p5 = scmp.ne.s32.totalorder %s672_s16, %s668_s15 }
   0x9   : > { %s896_s25 = smov (%p27_p0, %s26_s25), 0  ;;  %s898_s26 = smov (!%p27_p0, %s29_s26), %s692_s21 }
   0xa   : > { %s125_s27 = ssub.s32 %s688_s20, %s896_s25  ;;  %p777_p3 = por %p140_p2, %p139_p1 }
   0xb   : > { %p31_p4 = scmp.ge.s32.totalorder %s898_s26, 2  ;;  %p146_p6 = scmp.eq.s32.totalorder %s483_s24, 3 }
   0xc   : > { %p486_p7 = scmp.ge.s32.totalorder %s696_s22, 1  ;;  %p186_p9 = scmp.lt.s32.totalorder %s696_s22, 5 }
   0xd   : > { %s900_s26 = smov (%p31_p4, %s898_s26), 0  ;;  %p786_p8 = por %p146_p6, %p145_p5 }
   0xe   : > { %s124_s30 = ssub.s32 %s692_s21, %s900_s26  ;;  %s129_s5 = sadd.s32 1, %s676_s17 }
   0xf   : > { %s126_s6 = sor.u32 %s125_s27, %s124_s30  ;;  %p187_p10 = pnand %p486_p7, %p186_p9 }
  0x10   : > { %p127_p11 = scmp.eq.s32.totalorder %s126_s6, 0  ;;  %v599_v0 = vld [vmem:[%s882_s1] sm:$0xff] (!%p187_p10)   ;;  %s801_s10 = sshll.u32 (!%p187_p10), %s680_s18, 2  ;;  %vm249_vm0 = vcmask (!%p187_p10), 130048   ;;  %v601_v8 = vld [vmem:[%s884_s3 + $0x8] sm:$0xff] (!%p187_p10)   ;;  %vm323_vm1 = vcmask (!%p187_p10), 261120  }
  0x11   : > { %190 = sbr.rel (%p187_p10) target bundleno = 484 (0x1e4), region = 36  ;;  %p217_p12 = scmp.lt.s32.totalorder (!%p187_p10), %s684_s19, 1  ;;  %512 = vmatprep.subr.bf16.mxu0 (!%p187_p10), %v599_v0  ;;  %v600_v7 = vld [vmem:[%s884_s3] sm:$0xff] (!%p187_p10)   ;;  %vm379_vm2 = vcmask (!%p187_p10), 785408  }
  0x12   : > { %s795_s7 = scalar_select %p127_p11, %s676_s17, %s129_s5  }
  0x13   : > { %p219_p13 = scmp.lt.s32.totalorder (!%p187_p10), %s801_s10, 7  ;;  %513 = vmatpush3.bf16.msra.mxu0 (!%p187_p10), %v599_v0  ;;  %518 = vmatprep.subr.bf16.mxu1 (!%p187_p10), %v600_v7  ;;  %v491_v10 = vld [vmem:[%s883_s2] ss:$0 sm:$0xff] (!%p187_p10)  ;;  %s698_s8 = smov (!%p187_p10), [#allocation2]  }
  0x14   : > { %519 = vmatpush3.bf16.msra.mxu1 (!%p187_p10), %v600_v7  ;;  %s606_s9 = sshll.u32 (!%p187_p10), %s698_s8, 4  ;;  %s607_s9 = int_to_ptr.vmem [resolvable:$false] %s606_s9 }
  0x15   : > { %520 = vmatprep.subr.bf16.mxu1 (!%p187_p10), %v601_v8 }
  0x18   : > { %s218_s11 = scalar_select %p217_p12, %s684_s19, 1  ;;  %521 = vmatpush3.bf16.msra.mxu1 %v601_v8 }
  0x19   : > { %s220_s12 = scalar_select %p219_p13, %s801_s10, 7 }
  0x1a   : > { %s489_s13 = sshll.u32 %s218_s11, 3  ;;  %s608_s11 = scalar_lea.vmem %s607_s9, 1024 }
  0x1b   : > { %s222_s14 = sadd.s32 %s489_s13, %s220_s12  ;;  %s501_s12 = sshll.u32 %s684_s19, 3 }
  0x1c   : > { %s490_s23 = sshll.u32 %s222_s14, 3  ;;  %s213_s13 = sand.u32 1, %s672_s16  }
  0x1d   : > { %s224_s30 = scalar_lea.vmem %s881_s0, %s490_s23  ;;  %s397_s14 = sadd.s32 %s501_s12, %s801_s10 }
  0x1e   : > { %v228_v1 = vld [vmem:[%s224_s30] sm:$0xff]  ;;  %v229_v2 = vld [vmem:[%s224_s30 + $0x8] sm:$0xff]  ;;  %v230_v3 = vld [vmem:[%s224_s30 + $0x10] sm:$0xff]  ;;  %s487_s23 = sshll.u32 %s213_s13, 5  ;;  %s502_s24 = sshll.u32 %s397_s14, 7 }
  0x1f   : > { %v232_v4 = vpack.c.bf16 %v229_v2, %v228_v1  ;;  %v231_v5 = vld [vmem:[%s224_s30 + $0x18] sm:$0xff]  ;;  %s215_s27 = scalar_lea.vmem [#allocation2], %s487_s23  ;;  %s825_s6 = scalar_lea.hbm %s885_s4, %s502_s24 }
  0x20   : > { %v233_v6 = vpack.c.bf16 %v231_v5, %v230_v3  ;;  %s400_s30 = sshll.u32 %s215_s27, 4  ;;  %s829_s19 = scalar_lea.sflag [#allocation3], %s213_s13  ;;  %s827_s30 = int_to_ptr.vmem [resolvable:$true] %s400_s30 }
  0x21   : > { %514 = vmatprep.mubr.msk.bf16.mxu0 %vm249_vm0, %v232_v4  ;;  %s602_s10 = scalar_lea.vmem %s827_s30, 512  ;;  %p609_p4 = scmp.lt.s32.totalorder %s827_s30, %s607_s9 }
  0x22   : > { %515 = vmatmul.mubr.msk.bf16.vlgmr.msra.gmra.mrb[0].mxu0 %vm249_vm0, %v233_v6  ;;  %p603_p0 = scmp.ne.s32.totalorder %s827_s30, %s602_s10  ;;  %p610_p5 = scmp.lt.s32.totalorder %s608_s11, %s602_s10 }
  0x24   : > { %p604_p1 = pnand %p603_p0, %p777_p3  ;;  %p611_p6 = por %p610_p5, %p609_p4 }
  0x26   : > { %p605_p2 = pneg %p604_p1 }
  0x28   : > { %p612_p7 = pnand %p611_p6, %p605_p2 }
  0xf5   : > { %v516_v9 = vpop.f32.mrb[0].mxu0 }
  0xf6   : > { %v290_v11 = vpop.f32.mrb[1].mxu0  ;;  %v299_v13 = vadd.f32 %v516_v9, %v491_v10 }
  0xf7   : > { %v517_v12 = vpop.f32.mrb[2].mxu0  ;;  %v291_v16 = vadd.f32 %v491_v10, %v290_v11 }
  0xf8   : > { %v302_v14 = vadd.f32 %v517_v12, %v491_v10  ;;  %v293_v15 = vpop.f32.mrb[3].mxu0 }
  0xf9   : > { %v294_v17 = vadd.f32 %v491_v10, %v293_v15 }
  0xfa   : > { %v306_v18 = vpack.c.bf16 %v302_v14, %v299_v13 }
  0xfb   : > { %v305_v19 = vpack.c.bf16 %v294_v17, %v291_v16 }
  0xfd   : > { %522 = vmatprep.mubr.msk.bf16.mxu1 %vm323_vm1, %v305_v19 }
  0xfe   : > { %523 = vmatmul.mubr.msk.bf16.vlgmr.msra.gmra.mrb[0].mxu1 %vm323_vm1, %v306_v18 }
 0x1d1   : > { %v524_v20 = vpop.f32.mrb[0].mxu1 }
 0x1d2   : > { %382 = vst.msk [vmem:[%s215_s27 + $0x10] sm:$0xff] %vm379_vm2, %v524_v20  ;;  %v364_v21 = vpop.f32.mrb[1].mxu1 }
 0x1d3   : > { %380 = vst.msk [vmem:[%s215_s27] sm:$0xff] %vm379_vm2, %v364_v21  ;;  %v525_v22 = vpop.f32.mrb[2].mxu1 }
 0x1d4   : > { %383 = vst.msk [vmem:[%s215_s27 + $0x18] sm:$0xff] %vm379_vm2, %v525_v22  ;;  %v367_v23 = vpop.f32.mrb[3].mxu1 }
 0x1d5   : > { %381 = vst.msk [vmem:[%s215_s27 + $0x8] sm:$0xff] %vm379_vm2, %v367_v23 }
 0x1d6   : > { %615 = shalt.err (!%p612_p7)
}
 0x1d7   : > { %s616_s12 = scalar_lea.hbm %s825_s6, 512  ;;  %s620_s23 = scalar_lea.hbm %s885_s4, 2048 }
 0x1d8   : > { %p617_p9 = scmp.ne.s32.totalorder %s825_s6, %s616_s12  ;;  %p621_p12 = scmp.lt.u32.totalorder %s825_s6, %s885_s4 }
 0x1d9   : > { %p622_p13 = scmp.lt.u32.totalorder %s620_s23, %s616_s12  ;;  %p624_p1 = scmp.lt.u32.totalorder %s616_s12, %s825_s6 }
 0x1da   : > { %p618_p10 = pnand %p617_p9, %p777_p3 }
 0x1db   : > { %p623_p0 = por %p622_p13, %p621_p12 }
 0x1dc   : > { %p619_p11 = pneg %p618_p10 }
 0x1dd   : > { %p625_p2 = por %p624_p1, %p623_p0 }
 0x1df   : > { %p626_p4 = pnand %p625_p2, %p619_p11 }
 0x1e1   : > { %629 = shalt.err (!%p626_p4)
}
 0x1e2   : > { %s699_s18 = smov 128   ;;  %s700_s5 = smov 8  }
 0x1e3   : > { %526 = dma.vmem_to_hbm [thread:$0]  (%p777_p3), %s827_s30, 512, %s825_s6, %s829_s19, %s699_s18, %s699_s18, %s700_s5  }
 0x1e4 PF: > { %p532_p5 = scmp.ge.s32.totalorder %s696_s22, 2  ;;  %s415_s10 = sand.u32 1, %s668_s15  }
 0x1e5   : > { %s416_s8 = scalar_lea.sflag [#allocation3], %s415_s10 }
 0x1e6   : > { %p529_p6 = pnand %p532_p5, %p786_p8 }
 0x1e8   : > { %663 = dma.done.wait (!%p529_p6), %s416_s8, 512  }
 0x1e9   : > { %665 = vsyncadd (!%p529_p6), %s416_s8, 4294966784  ;;  %s17_s22 = sadd.s32 1, %s696_s22   ;;  %s888_s15 = smov %s672_s16 }
 0x1ea   : > { %p14_p7 = scmp.ge.s32.totalorder %s17_s22, 6   ;;  %s889_s16 = smov %s676_s17 }
 0x1eb   : > { %s890_s17 = smov %s795_s7  ;;  %s891_s18 = smov %s688_s20 }
 0x1ec   : > { %s892_s19 = smov %s692_s21  ;;  %s893_s20 = smov %s896_s25 }
 0x1ed   : > { %s894_s21 = smov %s900_s26  ;;  %16 = sbr.rel (!%p14_p7) target bundleno = 5 (0x5), region = 71 }
 0x1f4   :  { %421 = vsyncpa [#allocation3], 1 }
 0x1f5   :  { %423 = vsyncpa [#allocation3 + $0x1], 1 }

</bundles_post_ra>
